<compile_context>
chip_gen: v6e
topology: v6e:2x2x1
jax: 0.10.0
libtpu: 0.0.40
codegen_flags: <defaults>
</compile_context>

<pallas_src>
import functools

import jax
import jax.numpy as jnp
from jax.experimental import pallas as pl
from jax.experimental.pallas import tpu as pltpu


def _round_up(x, m):
    return (x + m - 1) // m * m


def _sublane_pack(dtype):
    return {1: 32, 2: 16, 4: 8}.get(jnp.dtype(dtype).itemsize, 8)


def _vmem_cap_bytes():
    """Generation-aware VMEM cap with ~16 MiB headroom for Mosaic scratch."""
    try:
        cap = int(pltpu.get_tpu_info().vmem_capacity_bytes)
    except Exception:
        cap = 64 * 2**20
    return max(cap - (16 << 20), (3 * cap) // 4)


# --------------------------------------------------------------------------
# kernel
# --------------------------------------------------------------------------
def _linear_block_kernel(x_ref, w_ref, p_ref, o_ref, acc_ref, *,
                         norm, activation, eps, n_real, n_pad):
    k = pl.program_id(2)

    @pl.when(k == 0)
    def _():
        acc_ref[...] = jnp.zeros_like(acc_ref)

    # fc partial: acc += x_tile @ Wt_tile  (native dtypes, f32 MXU accumulate)
    acc_ref[...] += jnp.dot(x_ref[...], w_ref[...],
                            preferred_element_type=jnp.float32)

    @pl.when(k == pl.num_programs(2) - 1)
    def _():
        y = acc_ref[...] + p_ref[0:1, :]            # bias broadcast [1, tn]

        if norm == "ln":
            # Custom LayerNorm: per-row mean and *unbiased* std over the real
            # features, normalize by (std + eps), then per-feature affine.
            # Padded columns of y are exactly 0 (zero weight cols + zero bias),
            # so the only correction needed is for the (0 - mean)^2 terms of
            # the n_pad padded columns.
            inv_n = 1.0 / float(n_real)
            mean = jnp.sum(y, axis=-1, keepdims=True) * inv_n
            diff = y - mean
            sq = (jnp.sum(diff * diff, axis=-1, keepdims=True)
                  - float(n_pad) * mean * mean)
            var_unbiased = jnp.maximum(sq, 0.0) / float(max(n_real - 1, 1))
            std = jnp.sqrt(var_unbiased)
            inv = pl.reciprocal(std + eps, approx=False)   # [tm, 1] EUP recip
            y = diff * inv
            y = y * p_ref[1:2, :] + p_ref[2:3, :]          # gamma / beta

        if activation == "relu":
            y = jnp.maximum(y, 0.0)
        elif activation == "lrelu":
            y = jnp.where(y >= 0.0, y, 0.2 * y)
        elif activation == "tanh":
            y = jnp.tanh(y)
        # 'none': identity

        o_ref[...] = y.astype(o_ref.dtype)


# --------------------------------------------------------------------------
# parameter preparation (once per parameter set, hoisted out of forward)
# --------------------------------------------------------------------------
def linear_block_prepare(weight, bias, gamma=None, beta=None, *,
                         norm="none", tn=512, tk=512):
    """Pre-transpose / pad parameters once. Returns a dict consumed by
    linear_block_apply."""
    Dout, Din = weight.shape

    Dout128 = _round_up(Dout, 128)
    if norm == "ln" or tn is None:
        tn_eff = Dout128                 # LN row reduction needs the full row
    else:
        tn_eff = min(_round_up(tn, 128), Dout128)
    Dout_p = _round_up(Dout, tn_eff)

    # K (Din) tiling only when Din exceeds tk; K tiles must be lane-aligned
    # (multiple of 128) so the x tile's last dim stays unmasked.
    if Din <= tk:
        tk_eff, Din_p = Din, Din
    else:
        tk_eff = _round_up(min(tk, Din), 128)
        Din_p = _round_up(Din, tk_eff)

    w_t = jnp.pad(weight.T, ((0, Din_p - Din), (0, Dout_p - Dout)))

    if norm == "ln":
        if gamma is None:
            gamma = jnp.ones((Dout,), jnp.float32)
        if beta is None:
            beta = jnp.zeros((Dout,), jnp.float32)
        params = jnp.stack([
            jnp.pad(bias.astype(jnp.float32), (0, Dout_p - Dout)),
            jnp.pad(gamma.astype(jnp.float32), (0, Dout_p - Dout)),
            jnp.pad(beta.astype(jnp.float32), (0, Dout_p - Dout)),
        ], axis=0)                                   # [3, Dout_p]
    else:
        params = jnp.pad(bias.astype(jnp.float32),
                         (0, Dout_p - Dout)).reshape(1, Dout_p)

    return dict(w_t=w_t, params=params, norm=norm,
                Din=Din, Dout=Dout, Din_p=Din_p, Dout_p=Dout_p,
                tn_eff=tn_eff, tk_eff=tk_eff)


# --------------------------------------------------------------------------
# forward
# --------------------------------------------------------------------------
def linear_block_apply(x, prep, *, activation="relu", eps=1e-5, tm=256):
    B, Din = x.shape
    assert Din == prep["Din"]
    norm = prep["norm"]
    w_t, params = prep["w_t"], prep["params"]
    Din_p, Dout_p, Dout = prep["Din_p"], prep["Dout_p"], prep["Dout"]
    tn_eff, tk_eff = prep["tn_eff"], prep["tk_eff"]
    out_dtype = x.dtype

    # ---- M tile: sublane-pack aligned, padding-minimizing ----
    pack = _sublane_pack(x.dtype)
    if B <= tm:
        tm_eff = _round_up(B, pack)
    else:
        n_m = -(-B // tm)
        tm_eff = _round_up(-(-B // n_m), pack)

    # ---- VMEM fit: shrink tm until footprint fits the generation cap ----
    cap = _vmem_cap_bytes()
    x_item = jnp.dtype(x.dtype).itemsize
    w_item = jnp.dtype(w_t.dtype).itemsize
    o_item = jnp.dtype(out_dtype).itemsize
    n_params = params.shape[0]

    def _est(tm_):
        return (2 * (tm_ * tk_eff * x_item          # x tile (double-buffered)
                     + tk_eff * tn_eff * w_item     # weight tile
                     + n_params * tn_eff * 4        # fused params tile
                     + tm_ * tn_eff * o_item)       # output tile
                + tm_ * tn_eff * 4                  # f32 accumulator scratch
                + tm_ * tn_eff * 4)                 # f32 intermediate y

    while _est(tm_eff) > cap and tm_eff > pack:
        tm_eff = max(_round_up(tm_eff // 2, pack), pack)

    Bp = _round_up(B, tm_eff)
    n_m = Bp // tm_eff
    n_n = Dout_p // tn_eff
    n_k = Din_p // tk_eff

    # ---- keep both v7x TensorCores busy when the parallel grid is (1,1) ----
    if n_m == 1 and n_n == 1 and Bp >= 2 * pack:
        tm_eff = _round_up(-(-B // 2), pack)
        Bp = _round_up(B, tm_eff)
        n_m = Bp // tm_eff

    xp = x
    if Bp != B or Din_p != Din:
        xp = jnp.pad(x, ((0, Bp - B), (0, Din_p - Din)))

    kernel = functools.partial(
        _linear_block_kernel, norm=norm, activation=activation, eps=eps,
        n_real=Dout, n_pad=Dout_p - Dout)

    vmem_limit = int(min(cap, max(_est(tm_eff) + (4 << 20), 32 << 20)))

    # Grid order: j (N) outer, i (M) inner, k (K) innermost/arbitrary.
    out = pl.pallas_call(
        kernel,
        out_shape=jax.ShapeDtypeStruct((Bp, Dout_p), out_dtype),
        grid_spec=pltpu.PrefetchScalarGridSpec(
            num_scalar_prefetch=0,
            grid=(n_n, n_m, n_k),
            in_specs=[
                pl.BlockSpec((tm_eff, tk_eff), lambda j, i, k: (i, k)),   # x
                pl.BlockSpec((tk_eff, tn_eff), lambda j, i, k: (k, j)),   # W^T
                pl.BlockSpec((n_params, tn_eff), lambda j, i, k: (0, j)), # fused params
            ],
            out_specs=pl.BlockSpec((tm_eff, tn_eff), lambda j, i, k: (i, j)),
            scratch_shapes=[pltpu.VMEM((tm_eff, tn_eff), jnp.float32)],
        ),
        compiler_params=pltpu.CompilerParams(
            dimension_semantics=("parallel", "parallel", "arbitrary"),
            vmem_limit_bytes=vmem_limit),
    )(xp, w_t, params)

    return out[:B, :Dout]


def linear_block(x, weight, bias, gamma=None, beta=None, *,
                 norm="none", activation="relu", eps=1e-5,
                 tm=256, tn=512, tk=512):
    """Convenience one-shot wrapper (prepare + apply)."""
    prep = linear_block_prepare(weight, bias, gamma, beta,
                                norm=norm, tn=tn, tk=tk)
    return linear_block_apply(x, prep, activation=activation, eps=eps, tm=tm)


# --------------------------------------------------------------------------
# reference + self-test
# --------------------------------------------------------------------------
def _reference(x, weight, bias, gamma, beta, norm, activation, eps=1e-5):
    y = x @ weight.T + bias
    if norm == "ln":
        mean = y.mean(axis=1, keepdims=True)
        std = jnp.sqrt(jnp.var(y, axis=1, keepdims=True, ddof=1))
        y = (y - mean) / (std + eps)
        y = y * gamma[None, :] + beta[None, :]
    if activation == "relu":
        y = jnp.maximum(y, 0.0)
    elif activation == "lrelu":
        y = jnp.where(y >= 0, y, 0.2 * y)
    elif activation == "tanh":
        y = jnp.tanh(y)
    return y


if __name__ == "__main__":
    key = jax.random.PRNGKey(0)
    ok = True

    # (B, Din, Dout, tn, tk): second shape exercises row/feature padding,
    # third exercises K tiling (Din_p=256, 2 K tiles), N tiling (2 N tiles
    # when norm='none') and the padding-minimizing / 2-block M split.
    configs = [
        (8, 32, 64, 512, 512),
        (6, 48, 72, 512, 512),
        (10, 192, 256, 128, 128),
    ]

    for (B, input_dim, output_dim, tn, tk) in configs:
        k_x, k_w, k_b, k_g, key = jax.random.split(key, 5)
        x = jax.random.normal(k_x, (B, input_dim), jnp.float32)

        bound = 1.0 / (input_dim ** 0.5)
        weight = jax.random.uniform(k_w, (output_dim, input_dim),
                                    jnp.float32, -bound, bound)
        bias = jax.random.uniform(k_b, (output_dim,), jnp.float32, -bound, bound)
        gamma = jax.random.uniform(k_g, (output_dim,), jnp.float32, 0.0, 1.0)
        beta = jnp.zeros((output_dim,), jnp.float32)

        for norm, act in [("none", "relu"), ("none", "lrelu"),
                          ("none", "none"), ("ln", "relu"), ("ln", "tanh")]:
            # prepare once per (params, norm) — the per-call forward does no
            # transpose/pad of the weight.
            prep = linear_block_prepare(weight, bias, gamma, beta,
                                        norm=norm, tn=tn, tk=tk)
            out = linear_block_apply(x, prep, activation=act)
            out = jax.block_until_ready(out)
            ref = _reference(x, weight, bias, gamma, beta, norm, act)
            if not jnp.allclose(out, ref, atol=1e-4, rtol=1e-4):
                ok = False
                print(f"MISMATCH shape=({B},{input_dim},{output_dim}) "
                      f"norm={norm} act={act} "
                      f"max_err={float(jnp.max(jnp.abs(out - ref)))}")

    if ok:
        print("KERNEL_OK")
</pallas_src>

<mosaic_0001>
module attributes {stable_mosaic.version = 11 : i64} {
  func.func @_linear_block_kernel(%arg0: i32, %arg1: i32, %arg2: i32, %arg3: memref<8x32xf32, #tpu.memory_space<vmem>>, %arg4: memref<32x128xf32, #tpu.memory_space<vmem>>, %arg5: memref<1x128xf32, #tpu.memory_space<vmem>>, %arg6: memref<8x128xf32, #tpu.memory_space<vmem>>, %arg7: memref<8x128xf32, #tpu.memory_space<vmem>>) attributes {dimension_semantics = [#tpu.dimension_semantics<parallel>, #tpu.dimension_semantics<parallel>, #tpu.dimension_semantics<arbitrary>], iteration_bounds = array<i64: 1, 1, 1>, scalar_prefetch = 0 : i64, scratch_operands = 1 : i64, tpu.core_type = #tpu.core_type<tc>, window_params = [{transform_indices = @transform_0, window_bounds = array<i64: 8, 32>}, {transform_indices = @transform_1, window_bounds = array<i64: 32, 128>}, {transform_indices = @transform_2, window_bounds = array<i64: 1, 128>}, {transform_indices = @transform_3, window_bounds = array<i64: 8, 128>}]} {
    %c0_i32 = arith.constant 0 : i32
    %0 = arith.cmpi eq, %arg2, %c0_i32 : i32
    %1 = arith.extui %0 : i1 to i32
    %c0_i32_0 = arith.constant 0 : i32
    %2 = arith.cmpi ne, %1, %c0_i32_0 : i32
    scf.if %2 {
      %cst_10 = arith.constant 0.000000e+00 : f32
      %12 = vector.broadcast %cst_10 : f32 to vector<8x128xf32>
      %c0_11 = arith.constant 0 : index
      %c0_12 = arith.constant 0 : index
      %13 = vector.load %arg7[%c0_11, %c0_12] : memref<8x128xf32, #tpu.memory_space<vmem>>, vector<8x128xf32>
      tpu.vector_store %arg7[%c0_11, %c0_12], %12 {strides = array<i32>} : memref<8x128xf32, #tpu.memory_space<vmem>>, vector<8x128xf32>,
    } else {
    }
    %c0 = arith.constant 0 : index
    %c0_1 = arith.constant 0 : index
    %3 = vector.load %arg7[%c0, %c0_1] : memref<8x128xf32, #tpu.memory_space<vmem>>, vector<8x128xf32>
    %c0_2 = arith.constant 0 : index
    %c0_3 = arith.constant 0 : index
    %4 = vector.load %arg3[%c0_2, %c0_3] : memref<8x32xf32, #tpu.memory_space<vmem>>, vector<8x32xf32>
    %c0_4 = arith.constant 0 : index
    %c0_5 = arith.constant 0 : index
    %5 = vector.load %arg4[%c0_4, %c0_5] : memref<32x128xf32, #tpu.memory_space<vmem>>, vector<32x128xf32>
    %cst = arith.constant dense<0.000000e+00> : vector<8x128xf32>
    %6 = tpu.matmul %4, %5, %cst {dimension_numbers = #tpu.dot_dimension_numbers<[1], [0], [0], [1], [0, 0, 1, 1], [], []>} : vector<8x32xf32>, vector<32x128xf32>, vector<8x128xf32> -> vector<8x128xf32>
    %7 = arith.addf %3, %6 : vector<8x128xf32>
    %c0_6 = arith.constant 0 : index
    %c0_7 = arith.constant 0 : index
    %8 = vector.load %arg7[%c0_6, %c0_7] : memref<8x128xf32, #tpu.memory_space<vmem>>, vector<8x128xf32>
    tpu.vector_store %arg7[%c0_6, %c0_7], %7 {strides = array<i32>} : memref<8x128xf32, #tpu.memory_space<vmem>>, vector<8x128xf32>,
    %c0_i32_8 = arith.constant 0 : i32
    %9 = arith.cmpi eq, %arg2, %c0_i32_8 : i32
    %10 = arith.extui %9 : i1 to i32
    %c0_i32_9 = arith.constant 0 : i32
    %11 = arith.cmpi ne, %10, %c0_i32_9 : i32
    scf.if %11 {
      %c0_10 = arith.constant 0 : index
      %c0_11 = arith.constant 0 : index
      %12 = vector.load %arg7[%c0_10, %c0_11] : memref<8x128xf32, #tpu.memory_space<vmem>>, vector<8x128xf32>
      %c0_12 = arith.constant 0 : index
      %c0_13 = arith.constant 0 : index
      %13 = vector.load %arg5[%c0_12, %c0_13] : memref<1x128xf32, #tpu.memory_space<vmem>>, vector<1x128xf32>
      %14 = vector.broadcast %13 : vector<1x128xf32> to vector<8x128xf32>
      %15 = arith.addf %12, %14 : vector<8x128xf32>
      %cst_14 = arith.constant 0.000000e+00 : f32
      %16 = vector.broadcast %cst_14 : f32 to vector<8x128xf32>
      %17 = arith.maximumf %15, %16 : vector<8x128xf32>
      %c0_15 = arith.constant 0 : index
      %c0_16 = arith.constant 0 : index
      %18 = vector.load %arg6[%c0_15, %c0_16] : memref<8x128xf32, #tpu.memory_space<vmem>>, vector<8x128xf32>
      tpu.vector_store %arg6[%c0_15, %c0_16], %17 {strides = array<i32>} : memref<8x128xf32, #tpu.memory_space<vmem>>, vector<8x128xf32>,
    } else {
    }
    return
  }
  func.func @transform_0(%arg0: i32, %arg1: i32, %arg2: i32) -> (i32, i32) {
    %c0_i32 = arith.constant 0 : i32
    return %arg1, %arg2 : i32, i32
  }
  func.func @transform_1(%arg0: i32, %arg1: i32, %arg2: i32) -> (i32, i32) {
    %c0_i32 = arith.constant 0 : i32
    return %arg2, %arg0 : i32, i32
  }
  func.func @transform_2(%arg0: i32, %arg1: i32, %arg2: i32) -> (i32, i32) {
    %c0_i32 = arith.constant 0 : i32
    %c0_i32_0 = arith.constant 0 : i32
    return %c0_i32, %arg0 : i32, i32
  }
  func.func @transform_3(%arg0: i32, %arg1: i32, %arg2: i32) -> (i32, i32) {
    %c0_i32 = arith.constant 0 : i32
    return %arg1, %arg0 : i32, i32
  }
}

</mosaic_0001>

<bundles_post_ra>
// kernel: tpu_custom_call.1
= control target key start
LH: loop header
LB: loop body
LE: loop exit
PB: predicated region body
PF: predicated region fallthrough
CT: control target
= control target key end

     0   :  { %8 = vsyncpa [#allocation4], 0  ;;  %s288_s0 = inlined_call_operand.hbm [shape: f32[8,32], index: 0, kind: input, shape index: {}]   ;;  %s289_s1 = inlined_call_operand.hbm [shape: f32[32,128], index: 1, kind: input, shape index: {}]   ;;  %s290_s2 = inlined_call_operand.vmem [shape: f32[1,128], index: 2, kind: input, shape index: {}]   ;;  %s291_s3 = inlined_call_operand.hbm [shape: f32[8,128], index: 3, kind: output, shape index: {}]  }
   0x1   :  { %9 = vsyncpa [#allocation7], 0 }
   0x2   :  { %10 = vsyncpa [#allocation5], 0  ;;  %s249_s12 = smov [#allocation3]   ;;  %s250_s14 = smov [#allocation6]  }
   0x3   :  { %s17_s13 = sshll.u32 %s249_s12, 4  ;;  %s26_s15 = sshll.u32 %s250_s14, 4  ;;  %s18_s13 = int_to_ptr.vmem [resolvable:$true] %s17_s13  ;;  %s27_s15 = int_to_ptr.vmem [resolvable:$true] %s26_s15 }
   0x4   :  { %s191_s16 = scalar_lea.vmem %s18_s13, 128  ;;  %p196_p1 = scmp.lt.s32.totalorder %s18_s13, %s18_s13 }
   0x5   :  { %p192_p0 = scmp.ne.s32.totalorder %s18_s13, %s191_s16  ;;  %p197_p2 = scmp.lt.s32.totalorder %s191_s16, %s191_s16 }
   0x7   :  { %p198_p3 = por %p197_p2, %p196_p1 }
   0x9   :  { %p199_p4 = pnand %p198_p3, %p192_p0 }
   0xb   :  { %202 = shalt.err (!%p199_p4)
}
   0xc   :  { %20 = dma.hbm_to_vmem [thread:$0]  %s288_s0, 128, %s18_s13, [#allocation4]  }
   0xd   :  { %s211_s19 = scalar_lea.vmem %s27_s15, 512  ;;  %p216_p6 = scmp.lt.s32.totalorder %s27_s15, %s27_s15 }
   0xe   :  { %p212_p5 = scmp.ne.s32.totalorder %s27_s15, %s211_s19  ;;  %p217_p7 = scmp.lt.s32.totalorder %s211_s19, %s211_s19 }
  0x10   :  { %p218_p8 = por %p217_p7, %p216_p6 }
  0x12   :  { %p219_p9 = pnand %p218_p8, %p212_p5 }
  0x14   :  { %222 = shalt.err (!%p219_p9)
}
  0x15   :  { %s251_s20 = smov 128   ;;  %s252_s21 = smov 8  }
  0x16   :  { %32 = dma.hbm_to_vmem [thread:$0]  %s289_s1, 512, %s27_s15, [#allocation7], %s251_s20, %s251_s20, %s252_s21  }
  0x17   :  { %243 = dma.done.wait [#allocation4], 128  }
  0x18   :  { %244 = vsyncadd [#allocation4], 4294967168 }
  0x19   :  { %245 = dma.done.wait [#allocation7], 512  }
  0x1a   :  { %246 = vsyncadd [#allocation7], 4294966784  ;;  %v253_v0 = vmov 0.0   ;;  %vm254_vm0 = vmmov 0   ;;  %v51_v1 = vld [vmem:[#allocation6 + $0x18] sm:$0xff]  ;;  %v50_v2 = vld [vmem:[#allocation6 + $0x10] sm:$0xff] }
  0x1b   :  { %165 = vmatprep.subr.mxu0 %v253_v0  ;;  %173 = vmatprep.mubr.msk.f32.mxu0 %vm254_vm0, %v253_v0  ;;  %v49_v3 = vld [vmem:[#allocation6 + $0x8] sm:$0xff]  ;;  %v48_v4 = vld [vmem:[#allocation6] sm:$0xff]  ;;  %v47_v5 = vld [vmem:[#allocation3] sm:$0xff]  ;;  %vm52_vm1 = vcmask 261120   ;;  %s255_s24 = smov [#allocation8]  }
  0x1c   :  { %166 = vmatpush3.msra.mxu0 %v51_v1  ;;  %v159_v6 = vld [vmem:[%s290_s2] ss:$0 sm:$0xff]  ;;  %s148_s25 = sshll.u32 %s255_s24, 4  ;;  %s149_s25 = int_to_ptr.vmem [resolvable:$true] %s148_s25 }
  0x1d   :  { %167 = vmatprep.subr.mxu0 %v253_v0  ;;  %s223_s26 = scalar_lea.vmem %s149_s25, 128  ;;  %p228_p11 = scmp.lt.s32.totalorder %s149_s25, %s149_s25 }
  0x1e   :  { %168 = vmatpush3.msra.mxu0 %v50_v2  ;;  %p224_p10 = scmp.ne.s32.totalorder %s149_s25, %s223_s26  ;;  %p229_p12 = scmp.lt.s32.totalorder %s223_s26, %s223_s26 }
  0x1f   :  { %169 = vmatprep.subr.mxu0 %v253_v0 }
  0x20   :  { %170 = vmatpush3.msra.mxu0 %v49_v3  ;;  %p230_p13 = por %p229_p12, %p228_p11 }
  0x21   :  { %171 = vmatprep.subr.mxu0 %v253_v0 }
  0x22   :  { %172 = vmatpush3.msra.mxu0 %v48_v4  ;;  %p231_p0 = pnand %p230_p13, %p224_p10 }
  0x23   :  { %174 = vmatmul.mubr.msk.f32.vlgmr.msra.gmra.mxu0 %vm52_vm1, %v47_v5 }
  0xe3   :  { %v122_v7 = vpop.f32.mrf.mxu0 }
  0xe4   :  { %v139_v8 = vadd.f32 %v159_v6, %v122_v7 }
  0xe5   :  { %v175_v9 = vpop.f32.mrf.mxu0 }
  0xe6   :  { %v140_v10 = vmax.f32 %v139_v8, 0.0 }
  0xe8   :  { %141 = vst [vmem:[#allocation8] sm:$0xff] %v140_v10 }
  0xe9   :  { %234 = shalt.err (!%p231_p0)
}
  0xea   :  { %151 = dma.vmem_to_hbm [thread:$0]  %s149_s25, 128, %s291_s3, [#allocation5]  }
  0xeb   :  { %247 = dma.done.wait [#allocation5], 128  }
  0xec   :  { %248 = vsyncadd [#allocation5], 4294967168 }
  0xed   :  { %155 = vsyncpa [#allocation4], 1 }
  0xee   :  { %156 = vsyncpa [#allocation7], 1 }
  0xef   :  { %157 = vsyncpa [#allocation5], 1 }

</bundles_post_ra>
